<compile_context>
chip_gen: v7x
topology: tpu7x:2x2x1
jax: 0.10.0
libtpu: 0.0.40
codegen_flags: <defaults>
</compile_context>

<pallas_src>
import functools

import jax
import jax.numpy as jnp
from jax.experimental import pallas as pl
from jax.experimental.pallas import tpu as pltpu  # noqa: F401  (TPU backend)


_LANES = 128  # vreg lane width


def _identity_kernel(x_ref, o_ref):
    # Pass-through hot path; a concrete subclass kernel replaces this body.
    o_ref[...] = x_ref[...]


def _lane_dense_2d(n_elems: int):
    """Pick a lane-dense 2-D view: last dim a full 128-lane multiple."""
    if n_elems % _LANES == 0:
        return n_elems // _LANES, _LANES
    # Fallback for awkward sizes (still a single contiguous row).
    return 1, n_elems


@functools.partial(jax.jit, donate_argnums=(0,))
def pallas_identity(x: jax.Array) -> jax.Array:
    """Lane-dense, aliased, single-block pass-through via pallas_call."""
    orig_shape = x.shape
    rows, lanes = _lane_dense_2d(x.size)
    x2d = x.reshape(rows, lanes)

    y2d = pl.pallas_call(
        _identity_kernel,
        out_shape=jax.ShapeDtypeStruct((rows, lanes), x.dtype),
        # No grid: single whole-array VMEM block (shape is tiny, ~8 KiB).
        in_specs=[pl.BlockSpec((rows, lanes), lambda: (0, 0))],
        out_specs=pl.BlockSpec((rows, lanes), lambda: (0, 0)),
        # Output aliases the input -> no extra HBM round trip for identity.
        input_output_aliases={0: 0},
    )(x2d)

    return y2d.reshape(orig_shape)


class AbstractNNModelPallas:
    """JAX/Pallas mirror of the PyTorch AbstractNNModel interface.

    The PyTorch module's __init__ registers no parameters and its methods
    return the NotImplementedError class (not a raised exception).  We
    reproduce that behavior exactly.
    """

    def __init__(self):
        # No parameters in the abstract base class.
        pass

    def forward(self, *argparams, **kwparams):
        # Exact semantics of the PyTorch module: RETURN (not raise) the
        # NotImplementedError class.
        return NotImplementedError

    def __call__(self, *argparams, **kwparams):
        return self.forward(*argparams, **kwparams)

    def greedy_policy(self, *argparams, **kwparams):
        return NotImplementedError

    def get_reward_horizon(self, game):
        return NotImplementedError


if __name__ == "__main__":
    key = jax.random.PRNGKey(0)
    # Small NCHW-style input consistent with what a DQN subclass would take.
    x = jax.random.normal(key, (2, 4, 16, 16), dtype=jnp.float32)
    # Independent copy kept for the correctness check (x itself is donated
    # to the kernel so its buffer can be aliased to the output).
    x_keep = jnp.array(x, copy=True)

    # 1) Interface-level check: abstract methods return NotImplementedError.
    model = AbstractNNModelPallas()
    assert model(x) is NotImplementedError
    assert model.greedy_policy(x) is NotImplementedError
    assert model.get_reward_horizon(None) is NotImplementedError

    # 2) Run the Pallas pass-through kernel (lane-dense, aliased).
    y = pallas_identity(x)  # x is donated; do not use x past this point
    y = jax.block_until_ready(y)
    assert y.shape == x_keep.shape and y.dtype == x_keep.dtype
    assert bool(jnp.allclose(y, x_keep))

    print("KERNEL_OK")
</pallas_src>

<mosaic_0001>
module attributes {stable_mosaic.version = 11 : i64} {
  func.func @_identity_kernel(%arg0: memref<16x128xf32, #tpu.memory_space<vmem>>, %arg1: memref<16x128xf32, #tpu.memory_space<vmem>>) attributes {dimension_semantics = [], scalar_prefetch = 0 : i64, scratch_operands = 0 : i64, tpu.core_type = #tpu.core_type<tc>} {
    %c0 = arith.constant 0 : index
    %c0_0 = arith.constant 0 : index
    %0 = vector.load %arg0[%c0, %c0_0] : memref<16x128xf32, #tpu.memory_space<vmem>>, vector<16x128xf32>
    %c0_1 = arith.constant 0 : index
    %c0_2 = arith.constant 0 : index
    %1 = vector.load %arg1[%c0_1, %c0_2] : memref<16x128xf32, #tpu.memory_space<vmem>>, vector<16x128xf32>
    tpu.vector_store %arg1[%c0_1, %c0_2], %0 {strides = array<i32>} : memref<16x128xf32, #tpu.memory_space<vmem>>, vector<16x128xf32>,
    return
  }
}

</mosaic_0001>

<bundles_post_ra>
// kernel: pallas_identity.1
= control target key start
LH: loop header
LB: loop body
LE: loop exit
PB: predicated region body
PF: predicated region fallthrough
CT: control target
= control target key end

     0   :  { %s38_s0 = inlined_call_operand.vmem [shape: f32[16,128], index: 0, kind: input, shape index: {}, may-alias: {0,1}]   ;;  %s39_s1 = inlined_call_operand.vmem [shape: f32[16,128], index: 1, kind: output, shape index: {}, may-alias: {0,1}]  }
   0x1   :  { %v8_v0 = vld [vmem:[%s38_s0] sm:$0xff]  ;;  %v9_v1 = vld [vmem:[%s38_s0 + $0x8] sm:$0xff] }
   0x2   :  { %10 = vst [vmem:[%s39_s1] sm:$0xff] %v8_v0  ;;  %11 = vst [vmem:[%s39_s1 + $0x8] sm:$0xff] %v9_v1 }

</bundles_post_ra>
